<compile_context>
chip_gen: v5e
topology: v5e:2x2
jax: 0.10.0
libtpu: 0.0.40
codegen_flags: <defaults>
</compile_context>

<pallas_src>
import functools

import jax
import jax.numpy as jnp
from jax.experimental import pallas as pl
from jax.experimental.pallas import tpu as pltpu


def _sinkhorn_kernel(x_ref, out_ref, work_ref, cols_ref, *,
                     num_iters: int, epsilon: float, world_size: int):
    B, K = x_ref.shape
    B_pad = work_ref.shape[0]
    tile_b = out_ref.shape[0]
    i = pl.program_id(0)

    # Views restricted to the real B rows (scratch may be row-padded so the
    # last output tile never reads out of bounds).
    w = work_ref if B == B_pad else work_ref.at[0:B, :]
    c = cols_ref if B == B_pad else cols_ref.at[0:B, :]

    @pl.when(i == 0)
    def _sinkhorn():
        inv_eps = jnp.float32(1.0 / epsilon)
        b_eff = jnp.float32(B * world_size)   # "B" in the reference
        k_val = jnp.float32(K)                # "K" in the reference

        # Benign values in the padded tail rows (masked on the final store,
        # but avoid inf/nan garbage from uninitialized scratch).
        if B_pad > B:
            work_ref[pl.ds(B, B_pad - B), :] = jnp.zeros((B_pad - B, K), jnp.float32)
            cols_ref[pl.ds(B, B_pad - B), :] = jnp.ones((B_pad - B, 1), jnp.float32)

        # Overflow-safe exp: the result is invariant to a global shift.  zmax
        # is taken on the raw input so no f32 copy of x lives across the max.
        zmax = jnp.max(x_ref[...]).astype(jnp.float32) * inv_eps
        m = jnp.exp(x_ref[...].astype(jnp.float32) * inv_eps - zmax)

        if num_iters == 0:
            # Reference: Q /= sum(Q); Q *= B  ->  per-tile multiply by b_eff/sum.
            w[...] = m
            c[...] = jnp.full((B, 1), jnp.sum(m) / b_eff, jnp.float32)
            return

        # First row-of-Q sum fused with the exp pass (no priming store of m).
        # (The reference's initial global `Q /= sum(Q)` is exactly cancelled by
        # the first per-prototype normalization, so it is skipped.)
        sum_rows = jnp.sum(m, axis=0, keepdims=True)            # (1, K)

        for it in range(num_iters):
            last = it == num_iters - 1
            if it > 0:
                m = w[...]
            # Per-prototype normalization (rows of Q == axis 0 of M); /K folded
            # into the reciprocal.  The per-sample sum is taken from the same
            # SSA value before the store (fused pass).
            scaled = m * pl.reciprocal(sum_rows * k_val, approx=False)
            sum_cols = jnp.sum(scaled, axis=1, keepdims=True)    # (B, 1)
            w[...] = scaled
            if last:
                # Final per-sample normalization (reference: /sum_cols, /B, *B
                # -> just /sum_cols) is applied per output tile below so its
                # HBM writeback overlaps compute.
                c[...] = sum_cols
            else:
                # Per-sample normalization (cols of Q == axis 1 of M); /B
                # folded; next row-sum taken from the same SSA value.
                nxt = w[...] * pl.reciprocal(sum_cols * b_eff, approx=False)
                sum_rows = jnp.sum(nxt, axis=0, keepdims=True)
                w[...] = nxt

    # Every grid step: final column-of-Q normalization for this B-tile written
    # straight to the output block, so the HBM writeback of tile i-1 overlaps
    # the (cheap) multiply of tile i.
    row0 = pl.multiple_of(i * tile_b, tile_b)
    tile = work_ref[pl.ds(row0, tile_b), :]
    inv_c = pl.reciprocal(cols_ref[pl.ds(row0, tile_b), :], approx=False)
    out_ref[...] = (tile * inv_c).astype(out_ref.dtype)


def _pick_tile_b(B: int, tile_b=None) -> int:
    """Output B-tile: must be a multiple of 8 or equal to the full B."""
    if tile_b is None:
        tile_b = 256
    tile_b = min(int(tile_b), B)
    if tile_b == B:
        return B
    if tile_b % 8 != 0:
        tile_b = max(8, (tile_b // 8) * 8)
    return B if tile_b >= B else tile_b


def sinkhorn_knopp(x: jax.Array, num_iters: int = 3, epsilon: float = 0.05,
                   world_size: int = 1, tile_b=None) -> jax.Array:
    """Pallas TPU implementation of SinkhornKnopp.forward.

    x: (B, K) cosine similarities between samples and prototypes.
    Returns: (B, K) float32 assignment matrix (same semantics as the PyTorch
    module's `Q.t()`).
    """
    assert x.ndim == 2, "expected (batch, prototypes)"
    B, K = x.shape
    tb = _pick_tile_b(B, tile_b)
    nb = -(-B // tb)
    B_pad = nb * tb

    kernel = functools.partial(_sinkhorn_kernel, num_iters=num_iters,
                               epsilon=epsilon, world_size=world_size)

    # VMEM budget: whole input + working slab + ~2 elementwise temps of the
    # same size + double-buffered output tiles + slack, clamped to physical.
    in_bytes = B * K * jnp.dtype(x.dtype).itemsize
    work_bytes = B_pad * K * 4
    tile_bytes = tb * K * 4
    need = in_bytes + 3 * work_bytes + 2 * tile_bytes + (1 << 20)
    try:
        cap = int(pltpu.get_tpu_info().vmem_capacity_bytes)
    except Exception:
        cap = 64 * 1024 * 1024
    vmem_limit = int(min(max(need, 32 * 1024 * 1024), int(cap * 0.9)))

    return pl.pallas_call(
        kernel,
        out_shape=jax.ShapeDtypeStruct((B, K), jnp.float32),
        grid=(nb,),
        in_specs=[
            # Whole array resident in VMEM, single-buffered (not gridded), so
            # no dead double-buffer copy is allocated.
            pl.BlockSpec(memory_space=pltpu.MemorySpace.VMEM),
        ],
        out_specs=pl.BlockSpec((tb, K), lambda i: (i, 0)),
        scratch_shapes=[
            pltpu.VMEM((B_pad, K), jnp.float32),   # working matrix M
            pltpu.VMEM((B_pad, 1), jnp.float32),   # per-sample sums for final norm
        ],
        compiler_params=pltpu.CompilerParams(
            dimension_semantics=("arbitrary",),
            vmem_limit_bytes=vmem_limit),
    )(x)


def _reference(x, num_iters=3, epsilon=0.05, world_size=1):
    """Pure-JAX transcription of the PyTorch forward (single-host path)."""
    q = jnp.exp(x.astype(jnp.float32) / epsilon).T          # (K, B)
    b_eff = q.shape[1] * world_size
    k = q.shape[0]
    q = q / jnp.sum(q)
    for _ in range(num_iters):
        q = q / jnp.sum(q, axis=1, keepdims=True)
        q = q / k
        q = q / jnp.sum(q, axis=0, keepdims=True)
        q = q / b_eff
    q = q * b_eff
    return q.T


if __name__ == "__main__":
    key = jax.random.PRNGKey(0)
    k1, k2 = jax.random.split(key)

    # Case 1: aligned shape (B=8 samples, K=128 prototypes), single B-tile.
    B, K = 8, 128
    x = jax.random.uniform(k1, (B, K), jnp.float32, -1.0, 1.0)
    out = jax.block_until_ready(jax.jit(sinkhorn_knopp)(x))
    ref = _reference(x)
    assert out.shape == (B, K)
    assert jnp.allclose(out, ref, rtol=2e-4, atol=1e-6), "mismatch (aligned)"

    # Case 2: ragged B and K, multiple B-tiles with a masked tail tile
    # (exercises the overlapped-writeback path and lane/sublane masking).
    B2, K2 = 28, 100
    x2 = jax.random.uniform(k2, (B2, K2), jnp.float32, -1.0, 1.0)
    out2 = jax.block_until_ready(
        jax.jit(functools.partial(sinkhorn_knopp, tile_b=8))(x2))
    ref2 = _reference(x2)
    assert out2.shape == (B2, K2)
    assert jnp.allclose(out2, ref2, rtol=2e-4, atol=1e-6), "mismatch (ragged)"

    # Case 3: num_iters=0 reference-parity path (global normalize only).
    out3 = jax.block_until_ready(
        jax.jit(functools.partial(sinkhorn_knopp, num_iters=0))(x))
    ref3 = _reference(x, num_iters=0)
    assert jnp.allclose(out3, ref3, rtol=2e-4, atol=1e-6), "mismatch (num_iters=0)"

    print("KERNEL_OK")
</pallas_src>

<mosaic_0001>
module attributes {stable_mosaic.version = 11 : i64} {
  func.func @_sinkhorn_kernel(%arg0: i32, %arg1: memref<8x128xf32, #tpu.memory_space<vmem>>, %arg2: memref<8x128xf32, #tpu.memory_space<vmem>>, %arg3: memref<8x128xf32, #tpu.memory_space<vmem>>, %arg4: memref<8x1xf32, #tpu.memory_space<vmem>>) attributes {dimension_semantics = [#tpu.dimension_semantics<arbitrary>], iteration_bounds = array<i64: 1>, scalar_prefetch = 0 : i64, scratch_operands = 2 : i64, tpu.core_type = #tpu.core_type<tc>, window_params = [{pipeline_mode = #tpu.pipeline_mode<synchronous>, transform_indices = @transform_0, window_bounds = array<i64: 8, 128>}, {transform_indices = @transform_1, window_bounds = array<i64: 8, 128>}]} {
    %c0_i32 = arith.constant 0 : i32
    %0 = arith.cmpi eq, %arg0, %c0_i32 : i32
    %1 = arith.extui %0 : i1 to i32
    %c0_i32_0 = arith.constant 0 : i32
    %2 = arith.cmpi ne, %1, %c0_i32_0 : i32
    scf.if %2 {
      %c0_4 = arith.constant 0 : index
      %c0_5 = arith.constant 0 : index
      %13 = vector.load %arg1[%c0_4, %c0_5] : memref<8x128xf32, #tpu.memory_space<vmem>>, vector<8x128xf32>
      %14 = vector.shape_cast %13 : vector<8x128xf32> to vector<1x8x128xf32>
      %cst = arith.constant dense<0xFF800000> : vector<1xf32>
      %15 = vector.multi_reduction <maximumf>, %14, %cst [1, 2] : vector<1x8x128xf32> to vector<1xf32>
      %16 = vector.shape_cast %15 : vector<1xf32> to vector<1x1x1xf32>
      %17 = vector.extract %16[0, 0, 0] : f32 from vector<1x1x1xf32>
      %cst_6 = arith.constant 2.000000e+01 : f32
      %18 = arith.mulf %17, %cst_6 : f32
      %c0_7 = arith.constant 0 : index
      %c0_8 = arith.constant 0 : index
      %19 = vector.load %arg1[%c0_7, %c0_8] : memref<8x128xf32, #tpu.memory_space<vmem>>, vector<8x128xf32>
      %cst_9 = arith.constant 2.000000e+01 : f32
      %20 = vector.broadcast %cst_9 : f32 to vector<8x128xf32>
      %21 = arith.mulf %19, %20 : vector<8x128xf32>
      %22 = vector.broadcast %18 : f32 to vector<8x128xf32>
      %23 = arith.subf %21, %22 : vector<8x128xf32>
      %24 = math.exp %23 : vector<8x128xf32>
      %cst_10 = arith.constant dense<0.000000e+00> : vector<128xf32>
      %25 = vector.multi_reduction <add>, %24, %cst_10 [0] : vector<8x128xf32> to vector<128xf32>
      %26 = vector.shape_cast %25 : vector<128xf32> to vector<1x128xf32>
      %cst_11 = arith.constant 1.280000e+02 : f32
      %27 = vector.broadcast %cst_11 : f32 to vector<1x128xf32>
      %28 = arith.mulf %26, %27 : vector<1x128xf32>
      %29 = tpu.reciprocal %28 : vector<1x128xf32> -> vector<1x128xf32>
      %30 = vector.broadcast %29 : vector<1x128xf32> to vector<8x128xf32>
      %31 = arith.mulf %24, %30 : vector<8x128xf32>
      %cst_12 = arith.constant dense<0.000000e+00> : vector<8xf32>
      %32 = vector.multi_reduction <add>, %31, %cst_12 [1] : vector<8x128xf32> to vector<8xf32>
      %33 = vector.shape_cast %32 : vector<8xf32> to vector<8x1xf32>
      %c0_13 = arith.constant 0 : index
      %c0_14 = arith.constant 0 : index
      %34 = vector.load %arg3[%c0_13, %c0_14] : memref<8x128xf32, #tpu.memory_space<vmem>>, vector<8x128xf32>
      tpu.vector_store %arg3[%c0_13, %c0_14], %31 {strides = array<i32>} : memref<8x128xf32, #tpu.memory_space<vmem>>, vector<8x128xf32>,
      %c0_15 = arith.constant 0 : index
      %c0_16 = arith.constant 0 : index
      %35 = vector.load %arg3[%c0_15, %c0_16] : memref<8x128xf32, #tpu.memory_space<vmem>>, vector<8x128xf32>
      %cst_17 = arith.constant 8.000000e+00 : f32
      %36 = vector.broadcast %cst_17 : f32 to vector<8x1xf32>
      %37 = arith.mulf %33, %36 : vector<8x1xf32>
      %38 = tpu.reciprocal %37 : vector<8x1xf32> -> vector<8x1xf32>
      %39 = vector.broadcast %38 : vector<8x1xf32> to vector<8x128xf32>
      %40 = arith.mulf %35, %39 : vector<8x128xf32>
      %cst_18 = arith.constant dense<0.000000e+00> : vector<128xf32>
      %41 = vector.multi_reduction <add>, %40, %cst_18 [0] : vector<8x128xf32> to vector<128xf32>
      %42 = vector.shape_cast %41 : vector<128xf32> to vector<1x128xf32>
      %c0_19 = arith.constant 0 : index
      %c0_20 = arith.constant 0 : index
      %43 = vector.load %arg3[%c0_19, %c0_20] : memref<8x128xf32, #tpu.memory_space<vmem>>, vector<8x128xf32>
      tpu.vector_store %arg3[%c0_19, %c0_20], %40 {strides = array<i32>} : memref<8x128xf32, #tpu.memory_space<vmem>>, vector<8x128xf32>,
      %c0_21 = arith.constant 0 : index
      %c0_22 = arith.constant 0 : index
      %44 = vector.load %arg3[%c0_21, %c0_22] : memref<8x128xf32, #tpu.memory_space<vmem>>, vector<8x128xf32>
      %cst_23 = arith.constant 1.280000e+02 : f32
      %45 = vector.broadcast %cst_23 : f32 to vector<1x128xf32>
      %46 = arith.mulf %42, %45 : vector<1x128xf32>
      %47 = tpu.reciprocal %46 : vector<1x128xf32> -> vector<1x128xf32>
      %48 = vector.broadcast %47 : vector<1x128xf32> to vector<8x128xf32>
      %49 = arith.mulf %44, %48 : vector<8x128xf32>
      %cst_24 = arith.constant dense<0.000000e+00> : vector<8xf32>
      %50 = vector.multi_reduction <add>, %49, %cst_24 [1] : vector<8x128xf32> to vector<8xf32>
      %51 = vector.shape_cast %50 : vector<8xf32> to vector<8x1xf32>
      %c0_25 = arith.constant 0 : index
      %c0_26 = arith.constant 0 : index
      %52 = vector.load %arg3[%c0_25, %c0_26] : memref<8x128xf32, #tpu.memory_space<vmem>>, vector<8x128xf32>
      tpu.vector_store %arg3[%c0_25, %c0_26], %49 {strides = array<i32>} : memref<8x128xf32, #tpu.memory_space<vmem>>, vector<8x128xf32>,
      %c0_27 = arith.constant 0 : index
      %c0_28 = arith.constant 0 : index
      %53 = vector.load %arg3[%c0_27, %c0_28] : memref<8x128xf32, #tpu.memory_space<vmem>>, vector<8x128xf32>
      %cst_29 = arith.constant 8.000000e+00 : f32
      %54 = vector.broadcast %cst_29 : f32 to vector<8x1xf32>
      %55 = arith.mulf %51, %54 : vector<8x1xf32>
      %56 = tpu.reciprocal %55 : vector<8x1xf32> -> vector<8x1xf32>
      %57 = vector.broadcast %56 : vector<8x1xf32> to vector<8x128xf32>
      %58 = arith.mulf %53, %57 : vector<8x128xf32>
      %cst_30 = arith.constant dense<0.000000e+00> : vector<128xf32>
      %59 = vector.multi_reduction <add>, %58, %cst_30 [0] : vector<8x128xf32> to vector<128xf32>
      %60 = vector.shape_cast %59 : vector<128xf32> to vector<1x128xf32>
      %c0_31 = arith.constant 0 : index
      %c0_32 = arith.constant 0 : index
      %61 = vector.load %arg3[%c0_31, %c0_32] : memref<8x128xf32, #tpu.memory_space<vmem>>, vector<8x128xf32>
      tpu.vector_store %arg3[%c0_31, %c0_32], %58 {strides = array<i32>} : memref<8x128xf32, #tpu.memory_space<vmem>>, vector<8x128xf32>,
      %c0_33 = arith.constant 0 : index
      %c0_34 = arith.constant 0 : index
      %62 = vector.load %arg3[%c0_33, %c0_34] : memref<8x128xf32, #tpu.memory_space<vmem>>, vector<8x128xf32>
      %cst_35 = arith.constant 1.280000e+02 : f32
      %63 = vector.broadcast %cst_35 : f32 to vector<1x128xf32>
      %64 = arith.mulf %60, %63 : vector<1x128xf32>
      %65 = tpu.reciprocal %64 : vector<1x128xf32> -> vector<1x128xf32>
      %66 = vector.broadcast %65 : vector<1x128xf32> to vector<8x128xf32>
      %67 = arith.mulf %62, %66 : vector<8x128xf32>
      %cst_36 = arith.constant dense<0.000000e+00> : vector<8xf32>
      %68 = vector.multi_reduction <add>, %67, %cst_36 [1] : vector<8x128xf32> to vector<8xf32>
      %69 = vector.shape_cast %68 : vector<8xf32> to vector<8x1xf32>
      %c0_37 = arith.constant 0 : index
      %c0_38 = arith.constant 0 : index
      %70 = vector.load %arg3[%c0_37, %c0_38] : memref<8x128xf32, #tpu.memory_space<vmem>>, vector<8x128xf32>
      tpu.vector_store %arg3[%c0_37, %c0_38], %67 {strides = array<i32>} : memref<8x128xf32, #tpu.memory_space<vmem>>, vector<8x128xf32>,
      %c0_39 = arith.constant 0 : index
      %c0_40 = arith.constant 0 : index
      %71 = vector.load %arg4[%c0_39, %c0_40] : memref<8x1xf32, #tpu.memory_space<vmem>>, vector<8x1xf32>
      tpu.vector_store %arg4[%c0_39, %c0_40], %69 {strides = array<i32>} : memref<8x1xf32, #tpu.memory_space<vmem>>, vector<8x1xf32>,
    } else {
    }
    %c8_i32 = arith.constant 8 : i32
    %3 = arith.muli %arg0, %c8_i32 : i32
    %4 = tpu.assume_multiple %3, 8 : i32
    %5 = arith.index_cast %4 : i32 to index
    %c0 = arith.constant 0 : index
    %6 = vector.load %arg3[%5, %c0] : memref<8x128xf32, #tpu.memory_space<vmem>>, vector<8x128xf32>
    %7 = arith.index_cast %4 : i32 to index
    %c0_1 = arith.constant 0 : index
    %8 = vector.load %arg4[%7, %c0_1] : memref<8x1xf32, #tpu.memory_space<vmem>>, vector<8x1xf32>
    %9 = tpu.reciprocal %8 : vector<8x1xf32> -> vector<8x1xf32>
    %10 = vector.broadcast %9 : vector<8x1xf32> to vector<8x128xf32>
    %11 = arith.mulf %6, %10 : vector<8x128xf32>
    %c0_2 = arith.constant 0 : index
    %c0_3 = arith.constant 0 : index
    %12 = vector.load %arg2[%c0_2, %c0_3] : memref<8x128xf32, #tpu.memory_space<vmem>>, vector<8x128xf32>
    tpu.vector_store %arg2[%c0_2, %c0_3], %11 {strides = array<i32>} : memref<8x128xf32, #tpu.memory_space<vmem>>, vector<8x128xf32>,
    return
  }
  func.func @transform_0(%arg0: i32) -> (i32, i32) {
    %c0_i32 = arith.constant 0 : i32
    %c0_i32_0 = arith.constant 0 : i32
    %c0_i32_1 = arith.constant 0 : i32
    return %c0_i32, %c0_i32_0 : i32, i32
  }
  func.func @transform_1(%arg0: i32) -> (i32, i32) {
    %c0_i32 = arith.constant 0 : i32
    %c0_i32_0 = arith.constant 0 : i32
    return %arg0, %c0_i32 : i32, i32
  }
}

</mosaic_0001>

<bundles_post_ra>
// kernel: sinkhorn_knopp.1
= control target key start
LH: loop header
LB: loop body
LE: loop exit
PB: predicated region body
PF: predicated region fallthrough
CT: control target
= control target key end

     0   :  { %6 = vsyncpa [#allocation5], 0  ;;  %s293_s0 = inlined_call_operand.hbm [shape: f32[8,128], index: 0, kind: input, shape index: {}]   ;;  %s294_s1 = inlined_call_operand.hbm [shape: f32[8,128], index: 1, kind: output, shape index: {}]  }
   0x1   :  { %7 = vsyncpa [#allocation6], 0  ;;  %s13_s8 = sshll.u32 %s293_s0, 4  ;;  %s274_s9 = smov [#allocation4]   ;;  %s14_s8 = int_to_ptr.hbm [resolvable:$true] %s13_s8 }
   0x2   :  { %s15_s10 = sshll.u32 %s274_s9, 4  ;;  %s16_s10 = int_to_ptr.vmem [resolvable:$true] %s15_s10 }
   0x3   :  { %18 = dma.hbm_to_vmem [thread:$0]  %s14_s8, 128, %s16_s10, [#allocation5]  }
   0x4   :  { %270 = dma.done.wait [#allocation5], 128  }
   0x5   :  { %271 = vsyncadd [#allocation5], 4294967168  ;;  %v27_v0 = vld [vmem:[#allocation4] sm:$0xff]  ;;  %s276_s12 = smov [#allocation7]   ;;  %s191_s16 = sshll.u32 %s294_s1, 4  ;;  %s192_s16 = int_to_ptr.hbm [resolvable:$true] %s191_s16 }
   0x6   :  { %28 = vmax.xlane.f32.xlu0 %v27_v0  ;;  %v38_v8 = vmul.f32 20.0, %v27_v0  ;;  %s189_s13 = sshll.u32 %s276_s12, 4  ;;  %s190_s13 = int_to_ptr.vmem [resolvable:$true] %s189_s13 }
  0x79   :  { %v29_v1 = vpop.xlane.xlu0 %28 }
  0x7a   :  { %v30_v2 = vrot.slane %v29_v1, 4 }
  0x7c   :  { %v31_v3 = vmax.f32 %v29_v1, %v30_v2 }
  0x7e   :  { %v32_v4 = vrot.slane %v31_v3, 2 }
  0x80   :  { %v33_v5 = vmax.f32 %v31_v3, %v32_v4 }
  0x82   :  { %v34_v6 = vrot.slane %v33_v5, 1 }
  0x84   :  { %v35_v7 = vmax.f32 %v33_v5, %v34_v6 }
  0x86   :  { %201 = vpush %v35_v7 }
  0xb7   :  { %s202_s11 = spop %201 }
  0xb8   :  { %s37_s0 = smul.f32 20.0, %s202_s11 }
  0xba   :  { %v39_v9 = vstv %s37_s0 }
  0xbb   :  { %v40_v10 = vsub.f32 %v38_v8, %v39_v9 }
  0xbd   :  { %v41_v11 = vmul.f32 1.442695, %v40_v10 }
  0xbf   :  { %208 = vpow2.f32 %v41_v11 }
  0xc5   :  { %v209_v12 = vpop.eup %208 }
  0xc6   :  { %v43_v13 = vrot.slane %v209_v12, 4 }
  0xc8   :  { %v44_v14 = vadd.f32 %v209_v12, %v43_v13 }
  0xca   :  { %v45_v15 = vrot.slane %v44_v14, 2 }
  0xcc   :  { %v46_v16 = vadd.f32 %v45_v15, %v44_v14 }
  0xce   :  { %v47_v17 = vrot.slane %v46_v16, 1 }
  0xd0   :  { %v48_v18 = vadd.f32 %v47_v17, %v46_v16 }
  0xd2   :  { %v49_v19 = vmul.f32 128.0, %v48_v18 }
  0xd4   :  { %210 = vrcp.f32 %v49_v19  ;;  %v61_v23 = vand.u32 2147483648, %v49_v19  ;;  %v59_v25 = vand.u32 2147483647, %v49_v19  ;;  %vm55_vm1 = vweird.f32 %v49_v19 }
  0xd6   :  { %v62_v27 = vor.u32 1.1754944e-38, %v61_v23  ;;  %vm60_vm3 = vcmp.eq.f32.partialorder %v59_v25, 8.507059e+37 }
  0xda   :  { %v211_v20 = vpop.eup %210 }
  0xdb   :  { %v51_v21 = vmul.f32 %v211_v20, %v49_v19  ;;  %vm56_vm0 = vweird.f32 %v211_v20 }
  0xdc   :  { %vm57_vm2 = vmor %vm55_vm1, %vm56_vm0 }
  0xdd   :  { %v52_v22 = vsub.f32 1.0, %v51_v21 }
  0xdf   :  { %v53_v24 = vmul.f32 %v211_v20, %v52_v22 }
  0xe1   :  { %v54_v26 = vadd.f32 %v211_v20, %v53_v24 }
  0xe3   :  { %v58_v28 = vsel %vm57_vm2, %v211_v20, %v54_v26 }
  0xe4   :  { %v63_v29 = vsel %vm60_vm3, %v62_v27, %v58_v28 }
  0xe5   :  { %v64_v30 = vmul.f32 %v209_v12, %v63_v29  ;;  %v275_v29 = vmov 0  }
  0xe6   :  { %206 = vset.pattern.permute.xlu2 %v275_v29  ;;  %207 = vset.pattern.permute.xlu0 %v275_v29 }
  0xe7   :  { %65 = vadd.xlane.f32.xlu0 %v64_v30 }
 0x15a   :  { %v66_v31 = vpop.xlane.xlu0 %65 }
 0x15b   :  { %v69_v32 = vmul.f32 8.0, %v66_v31 }
 0x15d   :  { %212 = vrcp.f32 %v69_v32  ;;  %v81_v36 = vand.u32 2147483648, %v69_v32  ;;  %v79_v38 = vand.u32 2147483647, %v69_v32  ;;  %vm75_vm5 = vweird.f32 %v69_v32 }
 0x15f   :  { %v82_v40 = vor.u32 1.1754944e-38, %v81_v36  ;;  %vm80_vm7 = vcmp.eq.f32.partialorder %v79_v38, 8.507059e+37 }
 0x163   :  { %v213_v33 = vpop.eup %212 }
 0x164   :  { %v71_v34 = vmul.f32 %v213_v33, %v69_v32  ;;  %vm76_vm4 = vweird.f32 %v213_v33 }
 0x165   :  { %vm77_vm6 = vmor %vm75_vm5, %vm76_vm4  ;;  %vm156_vm4 = vcmask 7168  }
 0x166   :  { %v72_v35 = vsub.f32 1.0, %v71_v34 }
 0x168   :  { %v73_v37 = vmul.f32 %v213_v33, %v72_v35 }
 0x16a   :  { %v74_v39 = vadd.f32 %v213_v33, %v73_v37 }
 0x16c   :  { %v78_v41 = vsel %vm77_vm6, %v213_v33, %v74_v39 }
 0x16d   :  { %v83_v42 = vsel %vm80_vm7, %v82_v40, %v78_v41 }
 0x16e   :  { %v84_v43 = vmul.f32 %v83_v42, %v64_v30 }
 0x170   :  { %v85_v44 = vrot.slane %v84_v43, 4 }
 0x172   :  { %v86_v45 = vadd.f32 %v85_v44, %v84_v43 }
 0x174   :  { %v87_v46 = vrot.slane %v86_v45, 2 }
 0x176   :  { %v88_v47 = vadd.f32 %v87_v46, %v86_v45 }
 0x178   :  { %v89_v48 = vrot.slane %v88_v47, 1 }
 0x17a   :  { %v90_v49 = vadd.f32 %v89_v48, %v88_v47 }
 0x17c   :  { %v93_v50 = vmul.f32 128.0, %v90_v49 }
 0x17e   :  { %214 = vrcp.f32 %v93_v50  ;;  %v105_v54 = vand.u32 2147483648, %v93_v50  ;;  %v103_v56 = vand.u32 2147483647, %v93_v50  ;;  %vm99_vm9 = vweird.f32 %v93_v50 }
 0x180   :  { %v106_v58 = vor.u32 1.1754944e-38, %v105_v54  ;;  %vm104_vm11 = vcmp.eq.f32.partialorder %v103_v56, 8.507059e+37 }
 0x184   :  { %v215_v51 = vpop.eup %214 }
 0x185   :  { %v95_v52 = vmul.f32 %v215_v51, %v93_v50  ;;  %vm100_vm8 = vweird.f32 %v215_v51 }
 0x186   :  { %vm101_vm10 = vmor %vm99_vm9, %vm100_vm8 }
 0x187   :  { %v96_v53 = vsub.f32 1.0, %v95_v52 }
 0x189   :  { %v97_v55 = vmul.f32 %v215_v51, %v96_v53 }
 0x18b   :  { %v98_v57 = vadd.f32 %v215_v51, %v97_v55 }
 0x18d   :  { %v102_v59 = vsel %vm101_vm10, %v215_v51, %v98_v57 }
 0x18e   :  { %v107_v60 = vsel %vm104_vm11, %v106_v58, %v102_v59 }
 0x18f   :  { %v108_v61 = vmul.f32 %v107_v60, %v84_v43 }
 0x191   :  { %109 = vadd.xlane.f32.xlu1 %v108_v61 }
 0x204   :  { %v110_v62 = vpop.xlane.xlu1 %109 }
 0x205   :  { %v113_v63 = vmul.f32 8.0, %v110_v62 }
 0x207   :  { %216 = vrcp.f32 %v113_v63  ;;  %v125_v3 = vand.u32 2147483648, %v113_v63  ;;  %v123_v5 = vand.u32 2147483647, %v113_v63  ;;  %vm119_vm13 = vweird.f32 %v113_v63 }
 0x209   :  { %v126_v7 = vor.u32 1.1754944e-38, %v125_v3  ;;  %vm124_vm15 = vcmp.eq.f32.partialorder %v123_v5, 8.507059e+37 }
 0x20d   :  { %v217_v0 = vpop.eup %216 }
 0x20e   :  { %v115_v1 = vmul.f32 %v217_v0, %v113_v63  ;;  %vm120_vm12 = vweird.f32 %v217_v0 }
 0x20f   :  { %vm121_vm14 = vmor %vm119_vm13, %vm120_vm12 }
 0x210   :  { %v116_v2 = vsub.f32 1.0, %v115_v1 }
 0x212   :  { %v117_v4 = vmul.f32 %v217_v0, %v116_v2 }
 0x214   :  { %v118_v6 = vadd.f32 %v217_v0, %v117_v4 }
 0x216   :  { %v122_v8 = vsel %vm121_vm14, %v217_v0, %v118_v6 }
 0x217   :  { %v127_v9 = vsel %vm124_vm15, %v126_v7, %v122_v8 }
 0x218   :  { %v128_v10 = vmul.f32 %v127_v9, %v108_v61 }
 0x21a   :  { %v129_v11 = vrot.slane %v128_v10, 4 }
 0x21c   :  { %v130_v12 = vadd.f32 %v129_v11, %v128_v10 }
 0x21e   :  { %v131_v13 = vrot.slane %v130_v12, 2 }
 0x220   :  { %v132_v14 = vadd.f32 %v131_v13, %v130_v12 }
 0x222   :  { %v133_v15 = vrot.slane %v132_v14, 1 }
 0x224   :  { %v134_v16 = vadd.f32 %v133_v15, %v132_v14 }
 0x226   :  { %v137_v17 = vmul.f32 128.0, %v134_v16 }
 0x228   :  { %218 = vrcp.f32 %v137_v17  ;;  %v149_v21 = vand.u32 2147483648, %v137_v17  ;;  %v147_v23 = vand.u32 2147483647, %v137_v17  ;;  %vm143_vm1 = vweird.f32 %v137_v17 }
 0x22a   :  { %v150_v25 = vor.u32 1.1754944e-38, %v149_v21  ;;  %vm148_vm3 = vcmp.eq.f32.partialorder %v147_v23, 8.507059e+37 }
 0x22e   :  { %v219_v18 = vpop.eup %218 }
 0x22f   :  { %v139_v19 = vmul.f32 %v219_v18, %v137_v17  ;;  %vm144_vm0 = vweird.f32 %v219_v18 }
 0x230   :  { %vm145_vm2 = vmor %vm143_vm1, %vm144_vm0 }
 0x231   :  { %v140_v20 = vsub.f32 1.0, %v139_v19 }
 0x233   :  { %v141_v22 = vmul.f32 %v219_v18, %v140_v20 }
 0x235   :  { %v142_v24 = vadd.f32 %v219_v18, %v141_v22 }
 0x237   :  { %v146_v26 = vsel %vm145_vm2, %v219_v18, %v142_v24 }
 0x238   :  { %v151_v27 = vsel %vm148_vm3, %v150_v25, %v146_v26 }
 0x239   :  { %v152_v28 = vmul.f32 %v151_v27, %v128_v10 }
 0x23b   :  { %153 = vadd.xlane.f32.xlu1 %v152_v28 }
 0x2ae   :  { %v154_v30 = vpop.xlane.xlu1 %153 }
 0x2af   :  { %157 = vst.msk [vmem:[#allocation3] sm:$0xff] %vm156_vm4, %v154_v30 }
 0x2b6   :  { %v162_v31 = vld [vmem:[#allocation3] sm:$0xff] }
 0x2b7   :  { %220 = vrcp.f32 %v162_v31  ;;  %v174_v35 = vand.u32 2147483648, %v162_v31  ;;  %v172_v37 = vand.u32 2147483647, %v162_v31  ;;  %vm168_vm6 = vweird.f32 %v162_v31 }
 0x2b9   :  { %v175_v39 = vor.u32 1.1754944e-38, %v174_v35  ;;  %vm173_vm8 = vcmp.eq.f32.partialorder %v172_v37, 8.507059e+37 }
 0x2bd   :  { %v221_v32 = vpop.eup %220 }
 0x2be   :  { %v164_v33 = vmul.f32 %v221_v32, %v162_v31  ;;  %vm169_vm5 = vweird.f32 %v221_v32 }
 0x2bf   :  { %vm170_vm7 = vmor %vm168_vm6, %vm169_vm5 }
 0x2c0   :  { %v165_v34 = vsub.f32 1.0, %v164_v33 }
 0x2c2   :  { %v166_v36 = vmul.f32 %v221_v32, %v165_v34 }
 0x2c4   :  { %v167_v38 = vadd.f32 %v221_v32, %v166_v36 }
 0x2c6   :  { %v171_v40 = vsel %vm170_vm7, %v221_v32, %v167_v38 }
 0x2c7   :  { %v176_v41 = vsel %vm173_vm8, %v175_v39, %v171_v40 }
 0x2c8   :  { %179 = vperm.xlu2 %206, %v176_v41  }
 0x322   :  { %v180_v42 = vpop.permute.xlu2 %179 }
 0x323   :  { %v182_v43 = vmul.f32 %v180_v42, %v152_v28 }
 0x325   :  { %183 = vst [vmem:[#allocation7] sm:$0xff] %v182_v43 }
 0x326   :  { %194 = dma.vmem_to_hbm [thread:$0]  %s190_s13, 128, %s192_s16, [#allocation6]  }
 0x327   :  { %272 = dma.done.wait [#allocation6], 128  }
 0x328   :  { %273 = vsyncadd [#allocation6], 4294967168 }
 0x329   :  { %199 = vsyncpa [#allocation5], 1 }
 0x32a   :  { %200 = vsyncpa [#allocation6], 1 }

</bundles_post_ra>
